<compile_context>
chip_gen: v7x
topology: tpu7x:2x2x1
jax: 0.10.0
libtpu: 0.0.40
codegen_flags: <defaults>
</compile_context>

<pallas_src>
import jax
import jax.numpy as jnp
from jax.experimental import pallas as pl
from jax.experimental.pallas import tpu as pltpu

_LANE = 128


# --------------------------------------------------------------------------
# Kernels
# --------------------------------------------------------------------------
def _copy_kernel(x_ref, o_ref):
    # Pure data movement: identity on values, flattened logical shape.
    o_ref[...] = x_ref[...]


def _dma_copy_kernel(x_hbm_ref, o_hbm_ref, sem):
    # Whole-array HBM -> HBM copy; no VMEM staging, no vector work at all.
    cp = pltpu.make_async_copy(x_hbm_ref, o_hbm_ref, sem)
    cp.start()
    cp.wait()


# --------------------------------------------------------------------------
# Tiling helpers (VMEM path)
# --------------------------------------------------------------------------
def _round_up(x, m):
    return -(-x // m) * m


def _block_byte_budget():
    """Per-block byte cap sized against each generation's scoped-VMEM default.

    Double-buffered input + output = 4 buffers x block:
      v5e : 4 x 3 MiB = 12 MiB < 16 MiB scoped default
      v6e : 4 x 6 MiB = 24 MiB < 32 MiB scoped default
      v7x : 4 x 6 MiB = 24 MiB < 32 MiB scoped default (64 MiB physical)
    """
    try:
        kind = jax.devices()[0].device_kind.lower()
    except Exception:
        kind = ""
    if "v6" in kind or "v7" in kind or "tpu7" in kind:
        return 6 * 1024 * 1024
    return 3 * 1024 * 1024  # conservative: safe on v5e and everything else


def _choose_tiles(n, f, itemsize, budget):
    """Pick (tm, tf) for a cdiv grid; edge blocks are masked by Pallas."""
    pack = 8 * max(1, 4 // itemsize)  # sublane multiple: 8 f32, 16 bf16, 32 int8
    row_bytes = f * itemsize

    if row_bytes <= budget:
        # Full-row blocks: fully contiguous in HBM, tile only the row axis.
        tf = f
        tm = max(pack, (budget // row_bytes) // pack * pack)
        if tm >= n:
            # Whole array fits one block. For big-enough arrays still split the
            # rows in two so v7x's second TensorCore gets fed.
            if n >= 2 * pack and n * row_bytes > (1 << 20):
                tm = _round_up(_round_up(n, 2) // 2, pack)
            else:
                tm = n  # full-extent block (always legal)
    else:
        # A single row exceeds the budget: also tile lanes in 128-multiples.
        tm = n if n <= pack else pack
        tf = max(_LANE, (budget // (tm * itemsize)) // _LANE * _LANE)
        tf = min(tf, max(_LANE, (f // _LANE) * _LANE))
        if tf >= f:
            tf = f
    return tm, tf


# --------------------------------------------------------------------------
# Materialized copies
# --------------------------------------------------------------------------
def _flatten_copy_dma(x2):
    """Whole-array HBM->HBM DMA copy of the already-flattened (N, F) array."""
    n, f = x2.shape
    itemsize = jnp.dtype(x2.dtype).itemsize
    return pl.pallas_call(
        _dma_copy_kernel,
        out_shape=jax.ShapeDtypeStruct((n, f), x2.dtype),
        in_specs=[pl.BlockSpec(memory_space=pl.ANY)],
        out_specs=pl.BlockSpec(memory_space=pl.ANY),
        scratch_shapes=[pltpu.SemaphoreType.DMA],
        cost_estimate=pl.CostEstimate(
            flops=0, transcendentals=0, bytes_accessed=2 * n * f * itemsize),
    )(x2)


def _flatten_copy_vmem(x2, block_byte_budget=None):
    """Tiled, software-pipelined VMEM copy of the flattened (N, F) array."""
    n, f = x2.shape
    dtype = x2.dtype
    itemsize = jnp.dtype(dtype).itemsize
    budget = block_byte_budget if block_byte_budget is not None else _block_byte_budget()

    tm, tf = _choose_tiles(n, f, itemsize, budget)
    grid = (pl.cdiv(n, tm), pl.cdiv(f, tf))

    return pl.pallas_call(
        _copy_kernel,
        out_shape=jax.ShapeDtypeStruct((n, f), dtype),
        grid_spec=pltpu.PrefetchScalarGridSpec(
            num_scalar_prefetch=0,
            grid=grid,
            in_specs=[pl.BlockSpec((tm, tf), lambda i, j: (i, j))],
            out_specs=pl.BlockSpec((tm, tf), lambda i, j: (i, j)),
        ),
        compiler_params=pltpu.CompilerParams(
            dimension_semantics=("parallel", "parallel"),
        ),
        cost_estimate=pl.CostEstimate(
            flops=0, transcendentals=0, bytes_accessed=2 * n * f * itemsize),
    )(x2)


# --------------------------------------------------------------------------
# Public forward
# --------------------------------------------------------------------------
def flatten_forward(x, *, materialize=False, method="dma", block_byte_budget=None):
    """Equivalent of Flatten.forward: x.view(-1, prod(x.shape[1:])).

    Default is the metadata-only reshape (free, matches torch .view).
    materialize=True copies into a fresh buffer:
      method="dma"  -> whole-array HBM->HBM DMA (default, no VMEM round trip)
      method="vmem" -> tiled, pipelined VMEM copy (cdiv grid, masked edges)
    """
    n = x.shape[0]
    f = 1
    for d in x.shape[1:]:
        f *= d

    x2 = x.reshape(n, f)  # metadata-only reshape; ideal cost is zero
    if not materialize:
        return x2
    if method == "dma":
        return _flatten_copy_dma(x2)
    return _flatten_copy_vmem(x2, block_byte_budget=block_byte_budget)


if __name__ == "__main__":
    key = jax.random.PRNGKey(0)
    k0, k1, k2 = jax.random.split(key, 3)

    # Small NCHW input consistent with the module's conv-style usage.
    x = jax.random.normal(k0, (2, 4, 16, 16), dtype=jnp.float32)
    ref = x.reshape(x.shape[0], -1)

    # 1) Default (fast) path: no kernel, pure metadata reshape.
    y_view = jax.block_until_ready(flatten_forward(x))
    assert y_view.shape == (2, 4 * 16 * 16), y_view.shape
    assert bool(jnp.array_equal(y_view, ref))

    # 2) Materialized copy via whole-array HBM->HBM DMA.
    y_dma = jax.block_until_ready(flatten_forward(x, materialize=True, method="dma"))
    assert y_dma.shape == ref.shape and y_dma.dtype == x.dtype
    assert bool(jnp.array_equal(y_dma, ref))

    # 3) Materialized copy via tiled VMEM pipeline (default per-gen budget).
    y_vmem = jax.block_until_ready(flatten_forward(x, materialize=True, method="vmem"))
    assert bool(jnp.array_equal(y_vmem, ref))

    # 4) Exercise the cdiv row grid with a masked edge block (ragged n, f).
    xr = jax.random.normal(k1, (20, 4, 16, 17), dtype=jnp.float32)  # F = 1088
    refr = xr.reshape(20, -1)
    yr = jax.block_until_ready(
        flatten_forward(xr, materialize=True, method="vmem",
                        block_byte_budget=32 * 1024))
    assert bool(jnp.array_equal(yr, refr))

    # 5) Exercise the lane-tiled branch (row bigger than budget) + masked lanes.
    xl = jax.random.normal(k2, (8, 4, 16, 17), dtype=jnp.float32)   # F = 1088
    refl = xl.reshape(8, -1)
    yl = jax.block_until_ready(
        flatten_forward(xl, materialize=True, method="vmem",
                        block_byte_budget=2 * 1024))
    assert bool(jnp.array_equal(yl, refl))

    print("KERNEL_OK")
</pallas_src>

<mosaic_0001>
module attributes {stable_mosaic.version = 11 : i64} {
  func.func @_dma_copy_kernel(%arg0: memref<2x1024xf32, #tpu.memory_space<any>>, %arg1: memref<2x1024xf32, #tpu.memory_space<any>>, %arg2: memref<!tpu.dma_semaphore, #tpu.memory_space<semaphore_mem>>) attributes {dimension_semantics = [], scalar_prefetch = 0 : i64, scratch_operands = 1 : i64, tpu.core_type = #tpu.core_type<tc>} {
    tpu.enqueue_dma source(%arg0 : memref<2x1024xf32, #tpu.memory_space<any>>) target(%arg1 : memref<2x1024xf32, #tpu.memory_space<any>>) target_semaphore(%arg2 : memref<!tpu.dma_semaphore, #tpu.memory_space<semaphore_mem>>)
    tpu.wait_dma2 semaphore(%arg2 : memref<!tpu.dma_semaphore, #tpu.memory_space<semaphore_mem>>) src(%arg0 : memref<2x1024xf32, #tpu.memory_space<any>>) dst(%arg1 : memref<2x1024xf32, #tpu.memory_space<any>>)
    return
  }
}

</mosaic_0001>

<bundles_post_ra>
// kernel: tpu_custom_call.1
= control target key start
LH: loop header
LB: loop body
LE: loop exit
PB: predicated region body
PF: predicated region fallthrough
CT: control target
= control target key end

     0   :  { %s35_s6 = smov [#allocation2]   ;;  %s36_s7 = smov [#allocation3]   ;;  %s54_s0 = inlined_call_operand.hbm [shape: f32[2,1024], index: 0, kind: input, shape index: {}]   ;;  %s55_s1 = inlined_call_operand.hbm [shape: f32[2,1024], index: 1, kind: output, shape index: {}]  }
   0x1   :  { %s37_s8 = smov 0  }
   0x2   :  { %18 = dma.general %s54_s0, 256, %s55_s1, %s35_s6, %s36_s7, [#allocation4], %s37_s8, 0  }
   0x3   :  { %33 = dma.done.wait [#allocation2], 256 }
   0x4   :  { %34 = vsyncadd [#allocation2], 4294967040 }
   0x5   :  { %23 = vsyncmov [#allocation2] }
   0x8   :  { %s24_s13 = vpop.sfrf %23 }
   0x9   :  { %p29_p0 = scmp.ne.s32.totalorder %s24_s13, 0 }
   0xb   :  { %28 = shalt.err (%p29_p0)  }

</bundles_post_ra>
